<compile_context>
chip_gen: v6e
topology: v6e:2x2x1
jax: 0.10.0
libtpu: 0.0.40
codegen_flags: <defaults>
</compile_context>

<pallas_src>
import functools

import jax
import jax.numpy as jnp
from jax import lax
from jax.experimental import pallas as pl
from jax.experimental.pallas import tpu as pltpu


def _round_up(x: int, m: int) -> int:
    return ((x + m - 1) // m) * m


_SQRT_HALF = 0.7071067811865476


# --------------------------------------------------------------------------
# Kernel bodies
# --------------------------------------------------------------------------
def _masked_layernorm(out, gamma, beta, eps, d_real):
    """LayerNorm over the last dim; padded columns (exact zeros) are masked."""
    inv_d = jnp.float32(1.0 / d_real)
    mean = jnp.sum(out, axis=-1, keepdims=True) * inv_d
    centered = out - mean
    if d_real != out.shape[-1]:
        col = lax.broadcasted_iota(jnp.int32, out.shape, 1)
        centered = jnp.where(col < d_real, centered, 0.0)
    var = jnp.sum(centered * centered, axis=-1, keepdims=True) * inv_d
    return centered * lax.rsqrt(var + jnp.float32(eps)) * gamma + beta


def _ffn_resident_kernel(x_ref, w1_ref, b1_ref, w2_ref, b2_ref,
                         gamma_ref, beta_ref, o_ref,
                         *, add_weight, eps, d_real):
    """Weights fully resident in VMEM; single grid axis over row tiles."""
    x = x_ref[...]                                               # (tm, Dp), input dtype
    w1 = w1_ref[...]
    h = jnp.dot(x.astype(w1.dtype), w1, preferred_element_type=jnp.float32)
    h = h + b1_ref[...]                                          # (tm, Fp) f32
    # Exact (erf) GELU, matching torch.nn.GELU default.  (On VALU-bound v5e the
    # tanh approximation would move this to the EUP, but changes numerics.)
    h = 0.5 * h * (1.0 + lax.erf(h * jnp.float32(_SQRT_HALF)))
    w2 = w2_ref[...]
    y = jnp.dot(h.astype(w2.dtype), w2, preferred_element_type=jnp.float32)
    y = y + b2_ref[...]
    out = x.astype(jnp.float32) + y * jnp.float32(add_weight)
    o_ref[...] = _masked_layernorm(out, gamma_ref[...], beta_ref[...],
                                   eps, d_real).astype(o_ref.dtype)


def _ffn_streaming_kernel(x_ref, w1_ref, b1_ref, w2_ref, b2_ref,
                          gamma_ref, beta_ref, o_ref, acc_ref,
                          *, add_weight, eps, d_real):
    """Feedforward dim streamed on an inner 'arbitrary' axis, f32 accumulator."""
    f = pl.program_id(1)

    @pl.when(f == 0)
    def _():
        acc_ref[...] = jnp.zeros_like(acc_ref)

    x = x_ref[...]
    w1 = w1_ref[...]
    h = jnp.dot(x.astype(w1.dtype), w1, preferred_element_type=jnp.float32)
    h = h + b1_ref[...]                                          # (tm, tf) f32
    h = 0.5 * h * (1.0 + lax.erf(h * jnp.float32(_SQRT_HALF)))
    w2 = w2_ref[...]
    acc_ref[...] += jnp.dot(h.astype(w2.dtype), w2,
                            preferred_element_type=jnp.float32)

    @pl.when(f == pl.num_programs(1) - 1)
    def _():
        y = acc_ref[...] + b2_ref[...]
        out = x_ref[...].astype(jnp.float32) + y * jnp.float32(add_weight)
        o_ref[...] = _masked_layernorm(out, gamma_ref[...], beta_ref[...],
                                       eps, d_real).astype(o_ref.dtype)


# --------------------------------------------------------------------------
# VMEM budgeting (generation-aware)
# --------------------------------------------------------------------------
@functools.lru_cache(maxsize=None)
def _vmem_budget_bytes() -> int:
    phys = 64 << 20                       # conservative fallback = v7x per-TC VMEM
    try:
        info = pltpu.get_tpu_info()
        cap = int(getattr(info, "vmem_capacity_bytes", 0) or 0)
        if cap > 0:
            phys = cap
    except Exception:
        pass
    # Leave ~16 MiB headroom for compiler-internal scratch; never request more
    # than ~100 MiB (so v5e/v6e 128 MiB parts keep slack, v7x caps at ~48 MiB).
    return int(min(max(phys - (16 << 20), 24 << 20), 100 << 20))


def _vmem_resident_bytes(tm, Dp, Fp, w_itm, xo_itm):
    return (2 * 2 * Dp * Fp * w_itm          # w1 + w2 (double-buffer allocation)
            + 4 * tm * Dp * xo_itm           # x / out tiles (double-buffered)
            + 2 * (Fp + 3 * Dp) * 4          # b1, b2, gamma, beta (f32)
            + 3 * tm * Fp * 4                # fc1 / GELU f32 temporaries
            + 4 * tm * Dp * 4)               # f32 epilogue temporaries


def _vmem_streaming_bytes(tm, tf, Dp, w_itm, xo_itm):
    return (2 * 2 * Dp * tf * w_itm          # w1 / w2 F-tiles (double-buffered)
            + 4 * tm * Dp * xo_itm           # x / out tiles (double-buffered)
            + 2 * (tf + 3 * Dp) * 4          # biases / gamma / beta (f32)
            + tm * Dp * 4                    # f32 accumulator scratch
            + 3 * tm * tf * 4                # fc1 / GELU f32 temporaries
            + 4 * tm * Dp * 4)               # f32 epilogue temporaries


def _pick_tm(rows, sub, cap):
    tm = max(sub, min(cap, _round_up(rows, sub)))
    # Ensure >=2 row tiles when rows allow, so both v7x TensorCores get work.
    # (Harmless on 1-TC chips: one extra ~0.35us grid step.)
    if _round_up(rows, tm) // tm < 2:
        half = _round_up(-(-rows // 2), sub)
        if half < tm:
            tm = half
    return tm


# --------------------------------------------------------------------------
# Parameter preparation (pad + cast once; reuse across calls)
# --------------------------------------------------------------------------
def prepare_params(params, *, compute_dtype=jnp.bfloat16):
    """Pad + cast parameters once so per-call paths do no HBM re-materialization.

    Linear weights are stored transposed vs. torch, i.e. (in_dim, out_dim), so
    the kernel computes x @ W directly. Padding is zeros, hence numerically
    inert (the kernel masks LayerNorm stats to the real hidden_dim).
    """
    w1 = jnp.asarray(params["w1"])
    w2 = jnp.asarray(params["w2"])
    D, F = w1.shape
    cd = jnp.dtype(compute_dtype)
    # 256-aligned (>128) fills the 256-wide MXUs on v6e/v7x; 128 = lane minimum.
    Dp = 128 if D <= 128 else _round_up(D, 256)
    Fp = 128 if F <= 128 else _round_up(F, 256)

    def mat(a, shape):
        a = a.astype(cd)
        if a.shape != shape:
            a = jnp.pad(a, ((0, shape[0] - a.shape[0]), (0, shape[1] - a.shape[1])))
        return a

    def vec(a, n):
        a = jnp.asarray(a).astype(jnp.float32).reshape(1, -1)
        if a.shape[1] != n:
            a = jnp.pad(a, ((0, 0), (0, n - a.shape[1])))
        return a

    return {
        "w1": mat(w1, (Dp, Fp)),
        "w2": mat(w2, (Fp, Dp)),
        "b1": vec(params["b1"], Fp),
        "b2": vec(params["b2"], Dp),
        "gamma": vec(params["gamma"], Dp),
        "beta": vec(params["beta"], Dp),
        "_meta": (int(D), int(F), int(Dp), int(Fp), str(cd)),
    }


# --------------------------------------------------------------------------
# Public wrapper
# --------------------------------------------------------------------------
def post_norm_feed_forward(hidden, params, *, add_weight=1.0, eps=1e-5,
                           tm=None, tf=None, matmul_dtype=None):
    """hidden: (batch, num_patches, hidden_dim) -> same shape.

    `params` is either the raw dict (see init_params) or prepare_params(...)
    output (preferred: padding/casting happens once). MXU operands default to
    bfloat16 (f32 accumulation, exact-precision residual, f32 LayerNorm); pass
    matmul_dtype=jnp.float32 for exact-f32 matmuls.
    """
    B, N, D_in = hidden.shape
    rows = B * N

    if "_meta" not in params:
        cd = (jnp.dtype(matmul_dtype) if matmul_dtype is not None
              else jnp.dtype(jnp.bfloat16))
        params = prepare_params(params, compute_dtype=cd)
    D, F, Dp, Fp, cd_str = params["_meta"]
    cd = jnp.dtype(cd_str)
    if D != D_in:
        raise ValueError(f"hidden_dim mismatch: params expect {D}, got {D_in}")

    w_itm = cd.itemsize
    xo_itm = jnp.dtype(hidden.dtype).itemsize
    sub = {4: 8, 2: 16, 1: 32}[min(w_itm, xo_itm)]   # sublane multiple for packing
    budget = _vmem_budget_bytes()

    # ---- choose weights-resident vs F-streamed path --------------------------
    use_resident = False
    tm_sel = None
    tf_sel = None
    if tf is None:                       # explicit tf forces the streamed path
        for cap in ((512, 256, 128) if tm is None else (None,)):
            t = _pick_tm(rows, sub, cap) if tm is None else _round_up(tm, sub)
            if _vmem_resident_bytes(t, Dp, Fp, w_itm, xo_itm) <= budget:
                use_resident, tm_sel = True, t
                break

    if not use_resident:
        if tf is not None:
            tf_sel = int(tf)
            if Fp % tf_sel != 0:
                raise ValueError(f"tf={tf_sel} must divide padded feedforward dim {Fp}")
        else:
            tf_sel = next(t for t in (512, 256, 128) if Fp % t == 0)
        if tm is not None:
            tm_sel = _round_up(tm, sub)
        else:
            tm_sel = _pick_tm(rows, sub, sub)
            for cap in (512, 256, 128, 64, 32):      # 512 first: weight-DMA amortization
                t = _pick_tm(rows, sub, cap)
                if _vmem_streaming_bytes(t, tf_sel, Dp, w_itm, xo_itm) <= budget:
                    tm_sel = t
                    break

    rows_p = _round_up(rows, tm_sel)

    est = (_vmem_resident_bytes(tm_sel, Dp, Fp, w_itm, xo_itm) if use_resident
           else _vmem_streaming_bytes(tm_sel, tf_sel, Dp, w_itm, xo_itm))
    vmem_limit = None
    if est > (12 << 20):
        vmem_limit = int(min(max(int(1.3 * est) + (2 << 20), 32 << 20), budget))

    # Activations keep their original dtype (exact residual + exact LN input);
    # only the matmul operands are cast to the compute dtype inside the kernel.
    x2d = hidden.reshape(rows, D)
    if rows_p != rows or Dp != D:
        x2d = jnp.pad(x2d, ((0, rows_p - rows), (0, Dp - D)))

    w1, b1, w2, b2 = params["w1"], params["b1"], params["w2"], params["b2"]
    gamma, beta = params["gamma"], params["beta"]

    def _spec(shape, index_map, mode=None):
        if mode is None:
            return pl.BlockSpec(shape, index_map)
        return pl.BlockSpec(shape, index_map, pipeline_mode=mode)

    def _call(use_single_buffering):
        # Grid-invariant operands need only one VMEM buffer; pl.Buffered(1)
        # reclaims the second buffer (helps most on v7x's 64 MiB VMEM).
        one = pl.Buffered(1) if use_single_buffering else None
        if use_resident:
            kernel = functools.partial(_ffn_resident_kernel,
                                       add_weight=float(add_weight),
                                       eps=float(eps), d_real=D)
            grid = (rows_p // tm_sel,)
            in_specs = [
                _spec((tm_sel, Dp), lambda i: (i, 0)),          # x row tile
                _spec((Dp, Fp), lambda i: (0, 0), one),         # w1: resident, DMA'd once
                _spec((1, Fp), lambda i: (0, 0), one),          # b1
                _spec((Fp, Dp), lambda i: (0, 0), one),         # w2: resident, DMA'd once
                _spec((1, Dp), lambda i: (0, 0), one),          # b2
                _spec((1, Dp), lambda i: (0, 0), one),          # ln gamma
                _spec((1, Dp), lambda i: (0, 0), one),          # ln beta
            ]
            out_specs = pl.BlockSpec((tm_sel, Dp), lambda i: (i, 0))
            scratch = []
            dims = ("parallel",)
        else:
            kernel = functools.partial(_ffn_streaming_kernel,
                                       add_weight=float(add_weight),
                                       eps=float(eps), d_real=D)
            grid = (rows_p // tm_sel, Fp // tf_sel)
            in_specs = [
                _spec((tm_sel, Dp), lambda i, f: (i, 0)),       # x row tile
                _spec((Dp, tf_sel), lambda i, f: (0, f)),       # fc1 weight F-tile
                _spec((1, tf_sel), lambda i, f: (0, f)),        # fc1 bias F-tile
                _spec((tf_sel, Dp), lambda i, f: (f, 0)),       # fc2 weight F-tile
                _spec((1, Dp), lambda i, f: (0, 0), one),       # b2
                _spec((1, Dp), lambda i, f: (0, 0), one),       # ln gamma
                _spec((1, Dp), lambda i, f: (0, 0), one),       # ln beta
            ]
            out_specs = pl.BlockSpec((tm_sel, Dp), lambda i, f: (i, 0))
            scratch = [pltpu.VMEM((tm_sel, Dp), jnp.float32)]
            dims = ("parallel", "arbitrary")

        return pl.pallas_call(
            kernel,
            out_shape=jax.ShapeDtypeStruct((rows_p, Dp), hidden.dtype),
            grid_spec=pltpu.PrefetchScalarGridSpec(
                num_scalar_prefetch=0,
                grid=grid,
                in_specs=in_specs,
                out_specs=out_specs,
                scratch_shapes=scratch),
            compiler_params=pltpu.CompilerParams(
                dimension_semantics=dims,
                vmem_limit_bytes=vmem_limit),
        )(x2d, w1, b1, w2, b2, gamma, beta)

    try:
        out2d = _call(True)      # single-buffer the grid-invariant operands
    except Exception:
        out2d = _call(False)     # fall back to default double buffering

    return out2d[:rows, :D].reshape(B, N, D)


# --------------------------------------------------------------------------
# Synthetic parameters + pure-JAX reference
# --------------------------------------------------------------------------
def init_params(key, hidden_dim, feedforward_dim):
    """Deterministic synthetic parameters (shapes match the PyTorch module).

    Linear weights are stored transposed vs. torch (in_dim, out_dim) so the
    kernel does x @ W directly.
    """
    k1, k2, k3, k4 = jax.random.split(key, 4)
    s1 = 1.0 / jnp.sqrt(hidden_dim)
    s2 = 1.0 / jnp.sqrt(feedforward_dim)
    return {
        "w1": jax.random.uniform(k1, (hidden_dim, feedforward_dim),
                                 jnp.float32, -s1, s1),
        "b1": jax.random.uniform(k2, (feedforward_dim,), jnp.float32, -s1, s1),
        "w2": jax.random.uniform(k3, (feedforward_dim, hidden_dim),
                                 jnp.float32, -s2, s2),
        "b2": jax.random.uniform(k4, (hidden_dim,), jnp.float32, -s2, s2),
        "gamma": jnp.ones((hidden_dim,), jnp.float32),
        "beta": jnp.zeros((hidden_dim,), jnp.float32),
    }


def _reference(hidden, params, add_weight=1.0, eps=1e-5):
    x = hidden.astype(jnp.float32)
    h = x @ params["w1"] + params["b1"]
    h = 0.5 * h * (1.0 + lax.erf(h / jnp.sqrt(2.0)))
    y = h @ params["w2"] + params["b2"]
    out = x + y * add_weight
    mean = out.mean(-1, keepdims=True)
    var = ((out - mean) ** 2).mean(-1, keepdims=True)
    return (out - mean) / jnp.sqrt(var + eps) * params["gamma"] + params["beta"]


if __name__ == "__main__":
    batch, num_patches, hidden_dim = 2, 8, 32
    feedforward_dim = hidden_dim * 4
    add_weight = 1.0

    key = jax.random.PRNGKey(0)
    k_x, k_p = jax.random.split(key)
    hidden = jax.random.normal(k_x, (batch, num_patches, hidden_dim), jnp.float32)
    params = init_params(k_p, hidden_dim, feedforward_dim)
    ref = _reference(hidden, params, add_weight=add_weight)

    # 1) Default path: weights resident in VMEM, bf16 MXU operands, f32 epilogue.
    prepped = prepare_params(params)               # pad + cast once, reuse per call
    out = post_norm_feed_forward(hidden, prepped, add_weight=add_weight)
    out = jax.block_until_ready(out)
    assert out.shape == (batch, num_patches, hidden_dim)
    assert jnp.allclose(out, ref, atol=5e-2, rtol=5e-2), "bf16 path mismatch"

    # 2) Exact-f32 MXU path (strict check vs the reference).
    out_f32 = post_norm_feed_forward(hidden, params, add_weight=add_weight,
                                     matmul_dtype=jnp.float32)
    out_f32 = jax.block_until_ready(out_f32)
    assert jnp.allclose(out_f32, ref, atol=1e-4, rtol=1e-4), "f32 path mismatch"

    # 3) F-streamed fallback path, exercised explicitly with a small tf.
    out_stream = post_norm_feed_forward(hidden, params, add_weight=add_weight,
                                        matmul_dtype=jnp.float32, tf=128)
    out_stream = jax.block_until_ready(out_stream)
    assert jnp.allclose(out_stream, ref, atol=1e-4, rtol=1e-4), "streaming path mismatch"

    print("KERNEL_OK")
</pallas_src>

<mosaic_0001>
module attributes {stable_mosaic.version = 11 : i64} {
  func.func @_ffn_resident_kernel(%arg0: i32, %arg1: memref<16x128xf32, #tpu.memory_space<vmem>>, %arg2: memref<128x128xbf16, #tpu.memory_space<vmem>>, %arg3: memref<1x128xf32, #tpu.memory_space<vmem>>, %arg4: memref<128x128xbf16, #tpu.memory_space<vmem>>, %arg5: memref<1x128xf32, #tpu.memory_space<vmem>>, %arg6: memref<1x128xf32, #tpu.memory_space<vmem>>, %arg7: memref<1x128xf32, #tpu.memory_space<vmem>>, %arg8: memref<16x128xf32, #tpu.memory_space<vmem>>) attributes {dimension_semantics = [#tpu.dimension_semantics<parallel>], iteration_bounds = array<i64: 1>, scalar_prefetch = 0 : i64, scratch_operands = 0 : i64, tpu.core_type = #tpu.core_type<tc>, window_params = [{transform_indices = @transform_0, window_bounds = array<i64: 16, 128>}, {pipeline_mode = #tpu.pipeline_mode<synchronous>, transform_indices = @transform_1, window_bounds = array<i64: 128, 128>}, {pipeline_mode = #tpu.pipeline_mode<synchronous>, transform_indices = @transform_2, window_bounds = array<i64: 1, 128>}, {pipeline_mode = #tpu.pipeline_mode<synchronous>, transform_indices = @transform_3, window_bounds = array<i64: 128, 128>}, {pipeline_mode = #tpu.pipeline_mode<synchronous>, transform_indices = @transform_4, window_bounds = array<i64: 1, 128>}, {pipeline_mode = #tpu.pipeline_mode<synchronous>, transform_indices = @transform_5, window_bounds = array<i64: 1, 128>}, {pipeline_mode = #tpu.pipeline_mode<synchronous>, transform_indices = @transform_6, window_bounds = array<i64: 1, 128>}, {transform_indices = @transform_7, window_bounds = array<i64: 16, 128>}]} {
    %c0 = arith.constant 0 : index
    %c0_0 = arith.constant 0 : index
    %0 = vector.load %arg1[%c0, %c0_0] : memref<16x128xf32, #tpu.memory_space<vmem>>, vector<16x128xf32>
    %c0_1 = arith.constant 0 : index
    %c0_2 = arith.constant 0 : index
    %1 = vector.load %arg2[%c0_1, %c0_2] : memref<128x128xbf16, #tpu.memory_space<vmem>>, vector<128x128xbf16>
    %2 = arith.truncf %0 : vector<16x128xf32> to vector<16x128xbf16>
    %cst = arith.constant dense<0.000000e+00> : vector<16x128xf32>
    %3 = tpu.matmul %2, %1, %cst {dimension_numbers = #tpu.dot_dimension_numbers<[1], [0], [0], [1], [0, 0, 1, 1], [], []>} : vector<16x128xbf16>, vector<128x128xbf16>, vector<16x128xf32> -> vector<16x128xf32>
    %c0_3 = arith.constant 0 : index
    %c0_4 = arith.constant 0 : index
    %4 = vector.load %arg3[%c0_3, %c0_4] : memref<1x128xf32, #tpu.memory_space<vmem>>, vector<1x128xf32>
    %5 = vector.broadcast %4 : vector<1x128xf32> to vector<16x128xf32>
    %6 = arith.addf %3, %5 : vector<16x128xf32>
    %cst_5 = arith.constant 5.000000e-01 : f32
    %7 = vector.broadcast %cst_5 : f32 to vector<16x128xf32>
    %8 = arith.mulf %7, %6 : vector<16x128xf32>
    %cst_6 = arith.constant 0.707106769 : f32
    %9 = vector.broadcast %cst_6 : f32 to vector<16x128xf32>
    %10 = arith.mulf %6, %9 : vector<16x128xf32>
    %11 = math.erf %10 : vector<16x128xf32>
    %cst_7 = arith.constant 1.000000e+00 : f32
    %12 = vector.broadcast %cst_7 : f32 to vector<16x128xf32>
    %13 = arith.addf %12, %11 : vector<16x128xf32>
    %14 = arith.mulf %8, %13 : vector<16x128xf32>
    %c0_8 = arith.constant 0 : index
    %c0_9 = arith.constant 0 : index
    %15 = vector.load %arg4[%c0_8, %c0_9] : memref<128x128xbf16, #tpu.memory_space<vmem>>, vector<128x128xbf16>
    %16 = arith.truncf %14 : vector<16x128xf32> to vector<16x128xbf16>
    %cst_10 = arith.constant dense<0.000000e+00> : vector<16x128xf32>
    %17 = tpu.matmul %16, %15, %cst_10 {dimension_numbers = #tpu.dot_dimension_numbers<[1], [0], [0], [1], [0, 0, 1, 1], [], []>} : vector<16x128xbf16>, vector<128x128xbf16>, vector<16x128xf32> -> vector<16x128xf32>
    %c0_11 = arith.constant 0 : index
    %c0_12 = arith.constant 0 : index
    %18 = vector.load %arg5[%c0_11, %c0_12] : memref<1x128xf32, #tpu.memory_space<vmem>>, vector<1x128xf32>
    %19 = vector.broadcast %18 : vector<1x128xf32> to vector<16x128xf32>
    %20 = arith.addf %17, %19 : vector<16x128xf32>
    %cst_13 = arith.constant 1.000000e+00 : f32
    %21 = vector.broadcast %cst_13 : f32 to vector<16x128xf32>
    %22 = arith.mulf %20, %21 : vector<16x128xf32>
    %23 = arith.addf %0, %22 : vector<16x128xf32>
    %c0_14 = arith.constant 0 : index
    %c0_15 = arith.constant 0 : index
    %24 = vector.load %arg6[%c0_14, %c0_15] : memref<1x128xf32, #tpu.memory_space<vmem>>, vector<1x128xf32>
    %c0_16 = arith.constant 0 : index
    %c0_17 = arith.constant 0 : index
    %25 = vector.load %arg7[%c0_16, %c0_17] : memref<1x128xf32, #tpu.memory_space<vmem>>, vector<1x128xf32>
    %cst_18 = arith.constant dense<0.000000e+00> : vector<16xf32>
    %26 = vector.multi_reduction <add>, %23, %cst_18 [1] : vector<16x128xf32> to vector<16xf32>
    %27 = vector.shape_cast %26 : vector<16xf32> to vector<16x1xf32>
    %cst_19 = arith.constant 3.125000e-02 : f32
    %28 = vector.broadcast %cst_19 : f32 to vector<16x1xf32>
    %29 = arith.mulf %27, %28 : vector<16x1xf32>
    %30 = vector.broadcast %29 : vector<16x1xf32> to vector<16x128xf32>
    %31 = arith.subf %23, %30 : vector<16x128xf32>
    %32 = tpu.iota {dimensions = array<i32: 1>} : vector<16x128xi32>
    %c32_i32 = arith.constant 32 : i32
    %33 = vector.broadcast %c32_i32 : i32 to vector<16x128xi32>
    %34 = arith.cmpi slt, %32, %33 : vector<16x128xi32>
    %cst_20 = arith.constant 0.000000e+00 : f32
    %35 = vector.broadcast %cst_20 : f32 to vector<16x128xf32>
    %36 = arith.select %34, %31, %35 : vector<16x128xi1>, vector<16x128xf32>
    %37 = arith.mulf %36, %36 : vector<16x128xf32>
    %cst_21 = arith.constant dense<0.000000e+00> : vector<16xf32>
    %38 = vector.multi_reduction <add>, %37, %cst_21 [1] : vector<16x128xf32> to vector<16xf32>
    %39 = vector.shape_cast %38 : vector<16xf32> to vector<16x1xf32>
    %cst_22 = arith.constant 3.125000e-02 : f32
    %40 = vector.broadcast %cst_22 : f32 to vector<16x1xf32>
    %41 = arith.mulf %39, %40 : vector<16x1xf32>
    %cst_23 = arith.constant 9.99999974E-6 : f32
    %42 = vector.broadcast %cst_23 : f32 to vector<16x1xf32>
    %43 = arith.addf %41, %42 : vector<16x1xf32>
    %44 = math.rsqrt %43 : vector<16x1xf32>
    %45 = vector.broadcast %44 : vector<16x1xf32> to vector<16x128xf32>
    %46 = arith.mulf %36, %45 : vector<16x128xf32>
    %47 = vector.broadcast %24 : vector<1x128xf32> to vector<16x128xf32>
    %48 = arith.mulf %46, %47 : vector<16x128xf32>
    %49 = vector.broadcast %25 : vector<1x128xf32> to vector<16x128xf32>
    %50 = arith.addf %48, %49 : vector<16x128xf32>
    %c0_24 = arith.constant 0 : index
    %c0_25 = arith.constant 0 : index
    %51 = vector.load %arg8[%c0_24, %c0_25] : memref<16x128xf32, #tpu.memory_space<vmem>>, vector<16x128xf32>
    tpu.vector_store %arg8[%c0_24, %c0_25], %50 {strides = array<i32>} : memref<16x128xf32, #tpu.memory_space<vmem>>, vector<16x128xf32>,
    return
  }
  func.func @transform_0(%arg0: i32) -> (i32, i32) {
    %c0_i32 = arith.constant 0 : i32
    %c0_i32_0 = arith.constant 0 : i32
    return %arg0, %c0_i32 : i32, i32
  }
  func.func @transform_1(%arg0: i32) -> (i32, i32) {
    %c0_i32 = arith.constant 0 : i32
    %c0_i32_0 = arith.constant 0 : i32
    %c0_i32_1 = arith.constant 0 : i32
    return %c0_i32, %c0_i32_0 : i32, i32
  }
  func.func @transform_2(%arg0: i32) -> (i32, i32) {
    %c0_i32 = arith.constant 0 : i32
    %c0_i32_0 = arith.constant 0 : i32
    %c0_i32_1 = arith.constant 0 : i32
    return %c0_i32, %c0_i32_0 : i32, i32
  }
  func.func @transform_3(%arg0: i32) -> (i32, i32) {
    %c0_i32 = arith.constant 0 : i32
    %c0_i32_0 = arith.constant 0 : i32
    %c0_i32_1 = arith.constant 0 : i32
    return %c0_i32, %c0_i32_0 : i32, i32
  }
  func.func @transform_4(%arg0: i32) -> (i32, i32) {
    %c0_i32 = arith.constant 0 : i32
    %c0_i32_0 = arith.constant 0 : i32
    %c0_i32_1 = arith.constant 0 : i32
    return %c0_i32, %c0_i32_0 : i32, i32
  }
  func.func @transform_5(%arg0: i32) -> (i32, i32) {
    %c0_i32 = arith.constant 0 : i32
    %c0_i32_0 = arith.constant 0 : i32
    %c0_i32_1 = arith.constant 0 : i32
    return %c0_i32, %c0_i32_0 : i32, i32
  }
  func.func @transform_6(%arg0: i32) -> (i32, i32) {
    %c0_i32 = arith.constant 0 : i32
    %c0_i32_0 = arith.constant 0 : i32
    %c0_i32_1 = arith.constant 0 : i32
    return %c0_i32, %c0_i32_0 : i32, i32
  }
  func.func @transform_7(%arg0: i32) -> (i32, i32) {
    %c0_i32 = arith.constant 0 : i32
    %c0_i32_0 = arith.constant 0 : i32
    return %arg0, %c0_i32 : i32, i32
  }
}

module attributes {stable_mosaic.version = 11 : i64} {
  func.func @_ffn_resident_kernel(%arg0: i32, %arg1: memref<16x128xf32, #tpu.memory_space<vmem>>, %arg2: memref<128x128xbf16, #tpu.memory_space<vmem>>, %arg3: memref<1x128xf32, #tpu.memory_space<vmem>>, %arg4: memref<128x128xbf16, #tpu.memory_space<vmem>>, %arg5: memref<1x128xf32, #tpu.memory_space<vmem>>, %arg6: memref<1x128xf32, #tpu.memory_space<vmem>>, %arg7: memref<1x128xf32, #tpu.memory_space<vmem>>, %arg8: memref<16x128xf32, #tpu.memory_space<vmem>>) attributes {dimension_semantics = [#tpu.dimension_semantics<parallel>], iteration_bounds = array<i64: 1>, scalar_prefetch = 0 : i64, scratch_operands = 0 : i64, tpu.core_type = #tpu.core_type<tc>, window_params = [{transform_indices = @transform_0, window_bounds = array<i64: 16, 128>}, {pipeline_mode = #tpu.pipeline_mode<synchronous>, transform_indices = @transform_1, window_bounds = array<i64: 128, 128>}, {pipeline_mode = #tpu.pipeline_mode<synchronous>, transform_indices = @transform_2, window_bounds = array<i64: 1, 128>}, {pipeline_mode = #tpu.pipeline_mode<synchronous>, transform_indices = @transform_3, window_bounds = array<i64: 128, 128>}, {pipeline_mode = #tpu.pipeline_mode<synchronous>, transform_indices = @transform_4, window_bounds = array<i64: 1, 128>}, {pipeline_mode = #tpu.pipeline_mode<synchronous>, transform_indices = @transform_5, window_bounds = array<i64: 1, 128>}, {pipeline_mode = #tpu.pipeline_mode<synchronous>, transform_indices = @transform_6, window_bounds = array<i64: 1, 128>}, {transform_indices = @transform_7, window_bounds = array<i64: 16, 128>}]} {
    %c0 = arith.constant 0 : index
    %c0_0 = arith.constant 0 : index
    %0 = vector.load %arg1[%c0, %c0_0] : memref<16x128xf32, #tpu.memory_space<vmem>>, vector<16x128xf32>
    %c0_1 = arith.constant 0 : index
    %c0_2 = arith.constant 0 : index
    %1 = vector.load %arg2[%c0_1, %c0_2] : memref<128x128xbf16, #tpu.memory_space<vmem>>, vector<128x128xbf16>
    %2 = arith.truncf %0 : vector<16x128xf32> to vector<16x128xbf16>
    %cst = arith.constant dense<0.000000e+00> : vector<16x128xf32>
    %3 = tpu.matmul %2, %1, %cst {dimension_numbers = #tpu.dot_dimension_numbers<[1], [0], [0], [1], [0, 0, 1, 1], [], []>} : vector<16x128xbf16>, vector<128x128xbf16>, vector<16x128xf32> -> vector<16x128xf32>
    %c0_3 = arith.constant 0 : index
    %c0_4 = arith.constant 0 : index
    %4 = vector.load %arg3[%c0_3, %c0_4] : memref<1x128xf32, #tpu.memory_space<vmem>>, vector<1x128xf32>
    %5 = vector.broadcast %4 : vector<1x128xf32> to vector<16x128xf32>
    %6 = arith.addf %3, %5 : vector<16x128xf32>
    %cst_5 = arith.constant 5.000000e-01 : f32
    %7 = vector.broadcast %cst_5 : f32 to vector<16x128xf32>
    %8 = arith.mulf %7, %6 : vector<16x128xf32>
    %cst_6 = arith.constant 0.707106769 : f32
    %9 = vector.broadcast %cst_6 : f32 to vector<16x128xf32>
    %10 = arith.mulf %6, %9 : vector<16x128xf32>
    %11 = math.erf %10 : vector<16x128xf32>
    %cst_7 = arith.constant 1.000000e+00 : f32
    %12 = vector.broadcast %cst_7 : f32 to vector<16x128xf32>
    %13 = arith.addf %12, %11 : vector<16x128xf32>
    %14 = arith.mulf %8, %13 : vector<16x128xf32>
    %c0_8 = arith.constant 0 : index
    %c0_9 = arith.constant 0 : index
    %15 = vector.load %arg4[%c0_8, %c0_9] : memref<128x128xbf16, #tpu.memory_space<vmem>>, vector<128x128xbf16>
    %16 = arith.truncf %14 : vector<16x128xf32> to vector<16x128xbf16>
    %cst_10 = arith.constant dense<0.000000e+00> : vector<16x128xf32>
    %17 = tpu.matmul %16, %15, %cst_10 {dimension_numbers = #tpu.dot_dimension_numbers<[1], [0], [0], [1], [0, 0, 1, 1], [], []>} : vector<16x128xbf16>, vector<128x128xbf16>, vector<16x128xf32> -> vector<16x128xf32>
    %c0_11 = arith.constant 0 : index
    %c0_12 = arith.constant 0 : index
    %18 = vector.load %arg5[%c0_11, %c0_12] : memref<1x128xf32, #tpu.memory_space<vmem>>, vector<1x128xf32>
    %19 = vector.broadcast %18 : vector<1x128xf32> to vector<16x128xf32>
    %20 = arith.addf %17, %19 : vector<16x128xf32>
    %cst_13 = arith.constant 1.000000e+00 : f32
    %21 = vector.broadcast %cst_13 : f32 to vector<16x128xf32>
    %22 = arith.mulf %20, %21 : vector<16x128xf32>
    %23 = arith.addf %0, %22 : vector<16x128xf32>
    %c0_14 = arith.constant 0 : index
    %c0_15 = arith.constant 0 : index
    %24 = vector.load %arg6[%c0_14, %c0_15] : memref<1x128xf32, #tpu.memory_space<vmem>>, vector<1x128xf32>
    %c0_16 = arith.constant 0 : index
    %c0_17 = arith.constant 0 : index
    %25 = vector.load %arg7[%c0_16, %c0_17] : memref<1x128xf32, #tpu.memory_space<vmem>>, vector<1x128xf32>
    %cst_18 = arith.constant dense<0.000000e+00> : vector<16xf32>
    %26 = vector.multi_reduction <add>, %23, %cst_18 [1] : vector<16x128xf32> to vector<16xf32>
    %27 = vector.shape_cast %26 : vector<16xf32> to vector<16x1xf32>
    %cst_19 = arith.constant 3.125000e-02 : f32
    %28 = vector.broadcast %cst_19 : f32 to vector<16x1xf32>
    %29 = arith.mulf %27, %28 : vector<16x1xf32>
    %30 = vector.broadcast %29 : vector<16x1xf32> to vector<16x128xf32>
    %31 = arith.subf %23, %30 : vector<16x128xf32>
    %32 = tpu.iota {dimensions = array<i32: 1>} : vector<16x128xi32>
    %c32_i32 = arith.constant 32 : i32
    %33 = vector.broadcast %c32_i32 : i32 to vector<16x128xi32>
    %34 = arith.cmpi slt, %32, %33 : vector<16x128xi32>
    %cst_20 = arith.constant 0.000000e+00 : f32
    %35 = vector.broadcast %cst_20 : f32 to vector<16x128xf32>
    %36 = arith.select %34, %31, %35 : vector<16x128xi1>, vector<16x128xf32>
    %37 = arith.mulf %36, %36 : vector<16x128xf32>
    %cst_21 = arith.constant dense<0.000000e+00> : vector<16xf32>
    %38 = vector.multi_reduction <add>, %37, %cst_21 [1] : vector<16x128xf32> to vector<16xf32>
    %39 = vector.shape_cast %38 : vector<16xf32> to vector<16x1xf32>
    %cst_22 = arith.constant 3.125000e-02 : f32
    %40 = vector.broadcast %cst_22 : f32 to vector<16x1xf32>
    %41 = arith.mulf %39, %40 : vector<16x1xf32>
    %cst_23 = arith.constant 9.99999974E-6 : f32
    %42 = vector.broadcast %cst_23 : f32 to vector<16x1xf32>
    %43 = arith.addf %41, %42 : vector<16x1xf32>
    %44 = math.rsqrt %43 : vector<16x1xf32>
    %45 = vector.broadcast %44 : vector<16x1xf32> to vector<16x128xf32>
    %46 = arith.mulf %36, %45 : vector<16x128xf32>
    %47 = vector.broadcast %24 : vector<1x128xf32> to vector<16x128xf32>
    %48 = arith.mulf %46, %47 : vector<16x128xf32>
    %49 = vector.broadcast %25 : vector<1x128xf32> to vector<16x128xf32>
    %50 = arith.addf %48, %49 : vector<16x128xf32>
    %c0_24 = arith.constant 0 : index
    %c0_25 = arith.constant 0 : index
    %51 = vector.load %arg8[%c0_24, %c0_25] : memref<16x128xf32, #tpu.memory_space<vmem>>, vector<16x128xf32>
    tpu.vector_store %arg8[%c0_24, %c0_25], %50 {strides = array<i32>} : memref<16x128xf32, #tpu.memory_space<vmem>>, vector<16x128xf32>,
    return
  }
  func.func @transform_0(%arg0: i32) -> (i32, i32) {
    %c0_i32 = arith.constant 0 : i32
    %c0_i32_0 = arith.constant 0 : i32
    return %arg0, %c0_i32 : i32, i32
  }
  func.func @transform_1(%arg0: i32) -> (i32, i32) {
    %c0_i32 = arith.constant 0 : i32
    %c0_i32_0 = arith.constant 0 : i32
    %c0_i32_1 = arith.constant 0 : i32
    return %c0_i32, %c0_i32_0 : i32, i32
  }
  func.func @transform_2(%arg0: i32) -> (i32, i32) {
    %c0_i32 = arith.constant 0 : i32
    %c0_i32_0 = arith.constant 0 : i32
    %c0_i32_1 = arith.constant 0 : i32
    return %c0_i32, %c0_i32_0 : i32, i32
  }
  func.func @transform_3(%arg0: i32) -> (i32, i32) {
    %c0_i32 = arith.constant 0 : i32
    %c0_i32_0 = arith.constant 0 : i32
    %c0_i32_1 = arith.constant 0 : i32
    return %c0_i32, %c0_i32_0 : i32, i32
  }
  func.func @transform_4(%arg0: i32) -> (i32, i32) {
    %c0_i32 = arith.constant 0 : i32
    %c0_i32_0 = arith.constant 0 : i32
    %c0_i32_1 = arith.constant 0 : i32
    return %c0_i32, %c0_i32_0 : i32, i32
  }
  func.func @transform_5(%arg0: i32) -> (i32, i32) {
    %c0_i32 = arith.constant 0 : i32
    %c0_i32_0 = arith.constant 0 : i32
    %c0_i32_1 = arith.constant 0 : i32
    return %c0_i32, %c0_i32_0 : i32, i32
  }
  func.func @transform_6(%arg0: i32) -> (i32, i32) {
    %c0_i32 = arith.constant 0 : i32
    %c0_i32_0 = arith.constant 0 : i32
    %c0_i32_1 = arith.constant 0 : i32
    return %c0_i32, %c0_i32_0 : i32, i32
  }
  func.func @transform_7(%arg0: i32) -> (i32, i32) {
    %c0_i32 = arith.constant 0 : i32
    %c0_i32_0 = arith.constant 0 : i32
    return %arg0, %c0_i32 : i32, i32
  }
}

</mosaic_0001>

<bundles_post_ra>
// kernel: tpu_custom_call.1
= control target key start
LH: loop header
LB: loop body
LE: loop exit
PB: predicated region body
PF: predicated region fallthrough
CT: control target
= control target key end

     0   :  { %12 = vsyncpa [#allocation3], 0  ;;  %s652_s0 = inlined_call_operand.hbm [shape: f32[16,128], index: 0, kind: input, shape index: {}]   ;;  %s653_s1 = inlined_call_operand.hbm [shape: bf16[128,128], index: 1, kind: input, shape index: {}]   ;;  %s654_s2 = inlined_call_operand.vmem [shape: f32[1,128], index: 2, kind: input, shape index: {}]   ;;  %s655_s3 = inlined_call_operand.hbm [shape: bf16[128,128], index: 3, kind: input, shape index: {}]   ;;  %s656_s4 = inlined_call_operand.vmem [shape: f32[1,128], index: 4, kind: input, shape index: {}]   ;;  %s657_s5 = inlined_call_operand.vmem [shape: f32[1,128], index: 5, kind: input, shape index: {}]   ;;  %s658_s6 = inlined_call_operand.vmem [shape: f32[1,128], index: 6, kind: input, shape index: {}]   ;;  %s659_s7 = inlined_call_operand.hbm [shape: f32[16,128], index: 7, kind: output, shape index: {}]  }
   0x1   :  { %13 = vsyncpa [#allocation6], 0 }
   0x2   :  { %14 = vsyncpa [#allocation4], 0  ;;  %s572_s24 = smov [#allocation5]  }
   0x3   :  { %s32_s25 = sshll.u32 %s572_s24, 4  ;;  %s33_s25 = int_to_ptr.vmem [resolvable:$true] %s32_s25 }
   0x4   :  { %s494_s26 = scalar_lea.vmem %s33_s25, 1024  ;;  %p499_p1 = scmp.lt.s32.totalorder %s33_s25, %s33_s25 }
   0x5   :  { %p495_p0 = scmp.ne.s32.totalorder %s33_s25, %s494_s26  ;;  %p500_p2 = scmp.lt.s32.totalorder %s494_s26, %s494_s26 }
   0x7   :  { %p501_p3 = por %p500_p2, %p499_p1 }
   0x9   :  { %p502_p4 = pnand %p501_p3, %p495_p0 }
   0xb   :  { %505 = shalt.err (!%p502_p4)
}
   0xc   :  { %s573_s27 = smov 64   ;;  %s574_s28 = smov 4  }
   0xd   :  { %38 = dma.hbm_to_vmem [thread:$0]  %s653_s1, 1024, %s33_s25, [#allocation6], %s573_s27, %s573_s27, %s574_s28  }
   0xe   :  { %s575_s8 = smov [#allocation2]  }
   0xf   :  { %s20_s9 = sshll.u32 %s575_s8, 4  ;;  %s21_s9 = int_to_ptr.vmem [resolvable:$true] %s20_s9 }
  0x10   :  { %s514_s10 = scalar_lea.vmem %s21_s9, 256  ;;  %p519_p6 = scmp.lt.s32.totalorder %s21_s9, %s21_s9 }
  0x11   :  { %p515_p5 = scmp.ne.s32.totalorder %s21_s9, %s514_s10  ;;  %p520_p7 = scmp.lt.s32.totalorder %s514_s10, %s514_s10 }
  0x13   :  { %p521_p8 = por %p520_p7, %p519_p6 }
  0x15   :  { %p522_p9 = pnand %p521_p8, %p515_p5 }
  0x17   :  { %525 = shalt.err (!%p522_p9)
}
  0x18   :  { %s576_s11 = smov 128   ;;  %s577_s12 = smov 8  }
  0x19   :  { %26 = dma.hbm_to_vmem [thread:$0]  %s652_s0, 256, %s21_s9, [#allocation3], %s576_s11, %s576_s11, %s577_s12  }
  0x1a   :  { %s578_s1 = smov [#allocation7]  }
  0x1b   :  { %s46_s15 = sshll.u32 %s578_s1, 4  ;;  %s47_s15 = int_to_ptr.vmem [resolvable:$true] %s46_s15 }
  0x1c   :  { %s534_s16 = scalar_lea.vmem %s47_s15, 1024  ;;  %p539_p11 = scmp.lt.s32.totalorder %s47_s15, %s47_s15 }
  0x1d   :  { %p535_p10 = scmp.ne.s32.totalorder %s47_s15, %s534_s16  ;;  %p540_p12 = scmp.lt.s32.totalorder %s534_s16, %s534_s16 }
  0x1f   :  { %p541_p13 = por %p540_p12, %p539_p11 }
  0x21   :  { %p542_p0 = pnand %p541_p13, %p535_p10 }
  0x23   :  { %545 = shalt.err (!%p542_p0)
}
  0x24   :  { %52 = dma.hbm_to_vmem [thread:$0]  %s655_s3, 1024, %s47_s15, [#allocation6], %s573_s27, %s573_s27, %s574_s28  }
  0x25   :  { %566 = dma.done.wait [#allocation3], 256  }
  0x26   :  { %567 = vsyncadd [#allocation3], 4294967040 }
  0x27   :  { %568 = dma.done.wait [#allocation6], 2048  }
  0x28   :  { %569 = vsyncadd [#allocation6], 4294965248  ;;  %v579_v0 = vmov 0.0   ;;  %vm580_vm0 = vmmov 0   ;;  %v462_v1 = vld [vmem:[#allocation5 + $0x38] sm:$0xff]   ;;  %v463_v2 = vld [vmem:[#allocation5 + $0x30] sm:$0xff]   ;;  %v319_v47 = vlaneseq }
  0x29   :  { %412 = vmatprep.subr.bf16.mxu0 %v579_v0  ;;  %428 = vmatprep.mubr.msk.bf16.mxu0 %vm580_vm0, %v579_v0  ;;  %v464_v3 = vld [vmem:[#allocation5 + $0x28] sm:$0xff]   ;;  %v465_v4 = vld [vmem:[#allocation5 + $0x20] sm:$0xff]   ;;  %v470_v5 = vld [vmem:[#allocation7 + $0x38] sm:$0xff]   ;;  %s581_s23 = smov [#allocation8]  }
  0x2a   :  { %432 = vmatprep.subr.bf16.mxu1 %v579_v0  ;;  %448 = vmatprep.mubr.msk.bf16.mxu1 %vm580_vm0, %v579_v0  ;;  %v466_v6 = vld [vmem:[#allocation5 + $0x18] sm:$0xff]   ;;  %v467_v7 = vld [vmem:[#allocation5 + $0x10] sm:$0xff]   ;;  %v468_v8 = vld [vmem:[#allocation5 + $0x8] sm:$0xff]   ;;  %v320_v48 = vand.u32 127, %v319_v47  ;;  %s361_s24 = sshll.u32 %s581_s23, 4  ;;  %s362_s24 = int_to_ptr.vmem [resolvable:$true] %s361_s24 }
  0x2b   :  { %413 = vmatpush3.bf16.msra.mxu0 %v462_v1  ;;  %433 = vmatpush3.bf16.msra.mxu1 %v470_v5  ;;  %v469_v9 = vld [vmem:[#allocation5] sm:$0xff]   ;;  %v69_v10 = vld [vmem:[#allocation2] sm:$0xff]  ;;  %v70_v11 = vld [vmem:[#allocation2 + $0x8] sm:$0xff]  ;;  %s546_s25 = scalar_lea.vmem %s362_s24, 256  ;;  %p551_p2 = scmp.lt.s32.totalorder %s362_s24, %s362_s24 }
  0x2c   :  { %414 = vmatprep.subr.bf16.mxu0 %v579_v0  ;;  %434 = vmatprep.subr.bf16.mxu1 %v579_v0  ;;  %v87_v12 = vpack.c.bf16 %v70_v11, %v69_v10  ;;  %v471_v13 = vld [vmem:[#allocation7 + $0x30] sm:$0xff]   ;;  %v472_v14 = vld [vmem:[#allocation7 + $0x28] sm:$0xff]   ;;  %v473_v15 = vld [vmem:[#allocation7 + $0x20] sm:$0xff]   ;;  %vm321_vm1 = vcmp.lt.s32.totalorder %v320_v48, 32  ;;  %p547_p1 = scmp.ne.s32.totalorder %s362_s24, %s546_s25  ;;  %p552_p3 = scmp.lt.s32.totalorder %s546_s25, %s546_s25 }
  0x2d   :  { %v474_v16 = vld [vmem:[#allocation7 + $0x18] sm:$0xff]   ;;  %v475_v17 = vld [vmem:[#allocation7 + $0x10] sm:$0xff]   ;;  %v476_v18 = vld [vmem:[#allocation7 + $0x8] sm:$0xff]  }
  0x2e   :  { %v477_v19 = vld [vmem:[#allocation7] sm:$0xff]   ;;  %v374_v20 = vld [vmem:[%s654_s2] ss:$0 sm:$0xff]  ;;  %p553_p4 = por %p552_p3, %p551_p2 }
  0x2f   :  { %415 = vmatpush3.bf16.msra.mxu0 %v463_v2  ;;  %435 = vmatpush3.bf16.msra.mxu1 %v471_v13  ;;  %v383_v38 = vld [vmem:[%s656_s4] ss:$0 sm:$0xff] }
  0x30   :  { %416 = vmatprep.subr.bf16.mxu0 %v579_v0  ;;  %436 = vmatprep.subr.bf16.mxu1 %v579_v0  ;;  %v392_v2 = vld [vmem:[%s657_s5] ss:$0 sm:$0xff]  ;;  %p554_p5 = pnand %p553_p4, %p547_p1 }
  0x33   :  { %417 = vmatpush3.bf16.msra.mxu0 %v464_v3  ;;  %437 = vmatpush3.bf16.msra.mxu1 %v472_v14 }
  0x34   :  { %418 = vmatprep.subr.bf16.mxu0 %v579_v0  ;;  %438 = vmatprep.subr.bf16.mxu1 %v579_v0 }
  0x37   :  { %419 = vmatpush3.bf16.msra.mxu0 %v465_v4  ;;  %439 = vmatpush3.bf16.msra.mxu1 %v473_v15  ;;  %v393_v4 = vld [vmem:[%s658_s6] ss:$0 sm:$0xff] }
  0x38   :  { %420 = vmatprep.subr.bf16.mxu0 %v579_v0  ;;  %440 = vmatprep.subr.bf16.mxu1 %v579_v0 }
  0x3b   :  { %421 = vmatpush3.bf16.msra.mxu0 %v466_v6  ;;  %441 = vmatpush3.bf16.msra.mxu1 %v474_v16 }
  0x3c   :  { %422 = vmatprep.subr.bf16.mxu0 %v579_v0  ;;  %442 = vmatprep.subr.bf16.mxu1 %v579_v0 }
  0x3f   :  { %423 = vmatpush3.bf16.msra.mxu0 %v467_v7  ;;  %443 = vmatpush3.bf16.msra.mxu1 %v475_v17 }
  0x40   :  { %424 = vmatprep.subr.bf16.mxu0 %v579_v0  ;;  %444 = vmatprep.subr.bf16.mxu1 %v579_v0 }
  0x43   :  { %425 = vmatpush3.bf16.msra.mxu0 %v468_v8  ;;  %445 = vmatpush3.bf16.msra.mxu1 %v476_v18 }
  0x44   :  { %426 = vmatprep.subr.bf16.mxu0 %v579_v0  ;;  %446 = vmatprep.subr.bf16.mxu1 %v579_v0 }
  0x47   :  { %427 = vmatpush3.bf16.msra.mxu0 %v469_v9  ;;  %447 = vmatpush3.bf16.msra.mxu1 %v477_v19 }
  0x4a   :  { %429 = vmatmul.mubr.bf16.vlgmr.msra.gmra.mxu0 %v87_v12 }
 0x10a   :  { %v177_v21 = vpop.f32.mrf.mxu0 }
 0x10b   :  { %v178_v22 = vadd.f32 %v374_v20, %v177_v21 }
 0x10c   :  { %v430_v23 = vpop.f32.mrf.mxu0 }
 0x10d   :  { %v186_v24 = vmul.f32 0.70710677, %v178_v22  ;;  %v184_v32 = vmul.f32 0.5, %v178_v22 }
 0x10e   :  { %v180_v25 = vpop.f32.mrf.mxu0 }
 0x10f   :  { %478 = verf.f32 %v186_v24  ;;  %v181_v26 = vadd.f32 %v374_v20, %v180_v25 }
 0x110   :  { %v431_v27 = vpop.f32.mrf.mxu0 }
 0x111   :  { %v187_v28 = vmul.f32 0.70710677, %v181_v26  ;;  %v185_v33 = vmul.f32 0.5, %v181_v26 }
 0x113   :  { %480 = verf.f32 %v187_v28 }
 0x11c   :  { %v479_v29 = vpop.eup %478 }
 0x11d   :  { %v190_v30 = vadd.f32 1.0, %v479_v29 }
 0x11f   :  { %v192_v35 = vmul.f32 %v190_v30, %v184_v32 }
 0x120   :  { %v481_v31 = vpop.eup %480 }
 0x121   :  { %v191_v34 = vadd.f32 1.0, %v481_v31 }
 0x123   :  { %v193_v36 = vmul.f32 %v191_v34, %v185_v33 }
 0x125   :  { %v210_v37 = vpack.c.bf16 %v193_v36, %v192_v35 }
 0x127   :  { %449 = vmatmul.mubr.bf16.vlgmr.msra.gmra.mxu1 %v210_v37 }
 0x1e7   :  { %v300_v39 = vpop.f32.mrf.mxu1 }
 0x1e8   :  { %v301_v40 = vadd.f32 %v383_v38, %v300_v39 }
 0x1e9   :  { %v450_v41 = vpop.f32.mrf.mxu1 }
 0x1ea   :  { %v307_v42 = vadd.f32 %v301_v40, %v69_v10 }
 0x1eb   :  { %v303_v43 = vpop.f32.mrf.mxu1 }
 0x1ec   :  { %v304_v44 = vadd.f32 %v383_v38, %v303_v43  ;;  %311 = vadd.xlane.f32.xlu0 %v307_v42 }
 0x1ed   :  { %v451_v45 = vpop.f32.mrf.mxu1 }
 0x1ee   :  { %v308_v46 = vadd.f32 %v304_v44, %v70_v11 }
 0x1f0   :  { %313 = vadd.xlane.f32.xlu0 %v308_v46 }
 0x275   :  { %v312_v49 = vpop.xlane.xlu0 %311 }
 0x276   :  { %v315_v50 = vmul.f32 0.03125, %v312_v49 }
 0x278   :  { %v317_v51 = vsub.f32 %v307_v42, %v315_v50 }
 0x279   :  { %v314_v52 = vpop.xlane.xlu0 %313 }
 0x27a   :  { %v316_v53 = vmul.f32 0.03125, %v314_v52  ;;  %v322_v54 = vsel %vm321_vm1, %v317_v51, 0.0 }
 0x27b   :  { %v324_v55 = vmul.f32 %v322_v54, %v322_v54 }
 0x27c   :  { %v318_v56 = vsub.f32 %v308_v46, %v316_v53 }
 0x27d   :  { %326 = vadd.xlane.f32.xlu1 %v324_v55 }
 0x27e   :  { %v323_v57 = vsel %vm321_vm1, %v318_v56, 0.0 }
 0x27f   :  { %v325_v58 = vmul.f32 %v323_v57, %v323_v57 }
 0x281   :  { %328 = vadd.xlane.f32.xlu1 %v325_v58 }
 0x306   :  { %v327_v59 = vpop.xlane.xlu1 %326 }
 0x307   :  { %v330_v60 = vmul.f32 0.03125, %v327_v59 }
 0x309   :  { %v332_v61 = vadd.f32 1e-05, %v330_v60 }
 0x30a   :  { %v329_v62 = vpop.xlane.xlu1 %328 }
 0x30b   :  { %482 = vrsqrt.f32 %v332_v61  ;;  %v331_v63 = vmul.f32 0.03125, %v329_v62 }
 0x30d   :  { %v333_v0 = vadd.f32 1e-05, %v331_v63 }
 0x30f   :  { %484 = vrsqrt.f32 %v333_v0 }
 0x318   :  { %v483_v1 = vpop.eup %482 }
 0x319   :  { %v336_v3 = vmul.f32 %v483_v1, %v322_v54 }
 0x31b   :  { %v344_v5 = vmul.f32 %v392_v2, %v336_v3 }
 0x31c   :  { %v485_v6 = vpop.eup %484 }
 0x31d   :  { %v337_v7 = vmul.f32 %v485_v6, %v323_v57  ;;  %v352_v8 = vadd.f32 %v393_v4, %v344_v5 }
 0x31f   :  { %v345_v9 = vmul.f32 %v392_v2, %v337_v7  ;;  %354 = vst [vmem:[#allocation8] sm:$0xff] %v352_v8 }
 0x321   :  { %v353_v10 = vadd.f32 %v393_v4, %v345_v9 }
 0x323   :  { %355 = vst [vmem:[#allocation8 + $0x8] sm:$0xff] %v353_v10 }
 0x324   :  { %557 = shalt.err (!%p554_p5)
}
 0x325   :  { %367 = dma.vmem_to_hbm [thread:$0]  %s362_s24, 256, %s659_s7, [#allocation4], %s576_s11, %s576_s11, %s577_s12  }
 0x326   :  { %570 = dma.done.wait [#allocation4], 256  }
 0x327   :  { %571 = vsyncadd [#allocation4], 4294967040 }
 0x328   :  { %371 = vsyncpa [#allocation3], 1 }
 0x329   :  { %372 = vsyncpa [#allocation6], 1 }
 0x32a   :  { %373 = vsyncpa [#allocation4], 1 }

// kernel: tpu_custom_call.1
= control target key start
LH: loop header
LB: loop body
LE: loop exit
PB: predicated region body
PF: predicated region fallthrough
CT: control target
= control target key end

     0   :  { %12 = vsyncpa [#allocation3], 0  ;;  %s652_s0 = inlined_call_operand.hbm [shape: f32[16,128], index: 0, kind: input, shape index: {}]   ;;  %s653_s1 = inlined_call_operand.hbm [shape: bf16[128,128], index: 1, kind: input, shape index: {}]   ;;  %s654_s2 = inlined_call_operand.vmem [shape: f32[1,128], index: 2, kind: input, shape index: {}]   ;;  %s655_s3 = inlined_call_operand.hbm [shape: bf16[128,128], index: 3, kind: input, shape index: {}]   ;;  %s656_s4 = inlined_call_operand.vmem [shape: f32[1,128], index: 4, kind: input, shape index: {}]   ;;  %s657_s5 = inlined_call_operand.vmem [shape: f32[1,128], index: 5, kind: input, shape index: {}]   ;;  %s658_s6 = inlined_call_operand.vmem [shape: f32[1,128], index: 6, kind: input, shape index: {}]   ;;  %s659_s7 = inlined_call_operand.hbm [shape: f32[16,128], index: 7, kind: output, shape index: {}]  }
   0x1   :  { %13 = vsyncpa [#allocation6], 0 }
   0x2   :  { %14 = vsyncpa [#allocation4], 0  ;;  %s572_s24 = smov [#allocation5]  }
   0x3   :  { %s32_s25 = sshll.u32 %s572_s24, 4  ;;  %s33_s25 = int_to_ptr.vmem [resolvable:$true] %s32_s25 }
   0x4   :  { %s494_s26 = scalar_lea.vmem %s33_s25, 1024  ;;  %p499_p1 = scmp.lt.s32.totalorder %s33_s25, %s33_s25 }
   0x5   :  { %p495_p0 = scmp.ne.s32.totalorder %s33_s25, %s494_s26  ;;  %p500_p2 = scmp.lt.s32.totalorder %s494_s26, %s494_s26 }
   0x7   :  { %p501_p3 = por %p500_p2, %p499_p1 }
   0x9   :  { %p502_p4 = pnand %p501_p3, %p495_p0 }
   0xb   :  { %505 = shalt.err (!%p502_p4)
}
   0xc   :  { %s573_s27 = smov 64   ;;  %s574_s28 = smov 4  }
   0xd   :  { %38 = dma.hbm_to_vmem [thread:$0]  %s653_s1, 1024, %s33_s25, [#allocation6], %s573_s27, %s573_s27, %s574_s28  }
   0xe   :  { %s575_s8 = smov [#allocation2]  }
   0xf   :  { %s20_s9 = sshll.u32 %s575_s8, 4  ;;  %s21_s9 = int_to_ptr.vmem [resolvable:$true] %s20_s9 }
  0x10   :  { %s514_s10 = scalar_lea.vmem %s21_s9, 256  ;;  %p519_p6 = scmp.lt.s32.totalorder %s21_s9, %s21_s9 }
  0x11   :  { %p515_p5 = scmp.ne.s32.totalorder %s21_s9, %s514_s10  ;;  %p520_p7 = scmp.lt.s32.totalorder %s514_s10, %s514_s10 }
  0x13   :  { %p521_p8 = por %p520_p7, %p519_p6 }
  0x15   :  { %p522_p9 = pnand %p521_p8, %p515_p5 }
  0x17   :  { %525 = shalt.err (!%p522_p9)
}
  0x18   :  { %s576_s11 = smov 128   ;;  %s577_s12 = smov 8  }
  0x19   :  { %26 = dma.hbm_to_vmem [thread:$0]  %s652_s0, 256, %s21_s9, [#allocation3], %s576_s11, %s576_s11, %s577_s12  }
  0x1a   :  { %s578_s1 = smov [#allocation7]  }
  0x1b   :  { %s46_s15 = sshll.u32 %s578_s1, 4  ;;  %s47_s15 = int_to_ptr.vmem [resolvable:$true] %s46_s15 }
  0x1c   :  { %s534_s16 = scalar_lea.vmem %s47_s15, 1024  ;;  %p539_p11 = scmp.lt.s32.totalorder %s47_s15, %s47_s15 }
  0x1d   :  { %p535_p10 = scmp.ne.s32.totalorder %s47_s15, %s534_s16  ;;  %p540_p12 = scmp.lt.s32.totalorder %s534_s16, %s534_s16 }
  0x1f   :  { %p541_p13 = por %p540_p12, %p539_p11 }
  0x21   :  { %p542_p0 = pnand %p541_p13, %p535_p10 }
  0x23   :  { %545 = shalt.err (!%p542_p0)
}
  0x24   :  { %52 = dma.hbm_to_vmem [thread:$0]  %s655_s3, 1024, %s47_s15, [#allocation6], %s573_s27, %s573_s27, %s574_s28  }
  0x25   :  { %566 = dma.done.wait [#allocation3], 256  }
  0x26   :  { %567 = vsyncadd [#allocation3], 4294967040 }
  0x27   :  { %568 = dma.done.wait [#allocation6], 2048  }
  0x28   :  { %569 = vsyncadd [#allocation6], 4294965248  ;;  %v579_v0 = vmov 0.0   ;;  %vm580_vm0 = vmmov 0   ;;  %v462_v1 = vld [vmem:[#allocation5 + $0x38] sm:$0xff]   ;;  %v463_v2 = vld [vmem:[#allocation5 + $0x30] sm:$0xff]   ;;  %v319_v47 = vlaneseq }
  0x29   :  { %412 = vmatprep.subr.bf16.mxu0 %v579_v0  ;;  %428 = vmatprep.mubr.msk.bf16.mxu0 %vm580_vm0, %v579_v0  ;;  %v464_v3 = vld [vmem:[#allocation5 + $0x28] sm:$0xff]   ;;  %v465_v4 = vld [vmem:[#allocation5 + $0x20] sm:$0xff]   ;;  %v470_v5 = vld [vmem:[#allocation7 + $0x38] sm:$0xff]   ;;  %s581_s23 = smov [#allocation8]  }
  0x2a   :  { %432 = vmatprep.subr.bf16.mxu1 %v579_v0  ;;  %448 = vmatprep.mubr.msk.bf16.mxu1 %vm580_vm0, %v579_v0  ;;  %v466_v6 = vld [vmem:[#allocation5 + $0x18] sm:$0xff]   ;;  %v467_v7 = vld [vmem:[#allocation5 + $0x10] sm:$0xff]   ;;  %v468_v8 = vld [vmem:[#allocation5 + $0x8] sm:$0xff]   ;;  %v320_v48 = vand.u32 127, %v319_v47  ;;  %s361_s24 = sshll.u32 %s581_s23, 4  ;;  %s362_s24 = int_to_ptr.vmem [resolvable:$true] %s361_s24 }
  0x2b   :  { %413 = vmatpush3.bf16.msra.mxu0 %v462_v1  ;;  %433 = vmatpush3.bf16.msra.mxu1 %v470_v5  ;;  %v469_v9 = vld [vmem:[#allocation5] sm:$0xff]   ;;  %v69_v10 = vld [vmem:[#allocation2] sm:$0xff]  ;;  %v70_v11 = vld [vmem:[#allocation2 + $0x8] sm:$0xff]  ;;  %s546_s25 = scalar_lea.vmem %s362_s24, 256  ;;  %p551_p2 = scmp.lt.s32.totalorder %s362_s24, %s362_s24 }
  0x2c   :  { %414 = vmatprep.subr.bf16.mxu0 %v579_v0  ;;  %434 = vmatprep.subr.bf16.mxu1 %v579_v0  ;;  %v87_v12 = vpack.c.bf16 %v70_v11, %v69_v10  ;;  %v471_v13 = vld [vmem:[#allocation7 + $0x30] sm:$0xff]   ;;  %v472_v14 = vld [vmem:[#allocation7 + $0x28] sm:$0xff]   ;;  %v473_v15 = vld [vmem:[#allocation7 + $0x20] sm:$0xff]   ;;  %vm321_vm1 = vcmp.lt.s32.totalorder %v320_v48, 32  ;;  %p547_p1 = scmp.ne.s32.totalorder %s362_s24, %s546_s25  ;;  %p552_p3 = scmp.lt.s32.totalorder %s546_s25, %s546_s25 }
  0x2d   :  { %v474_v16 = vld [vmem:[#allocation7 + $0x18] sm:$0xff]   ;;  %v475_v17 = vld [vmem:[#allocation7 + $0x10] sm:$0xff]   ;;  %v476_v18 = vld [vmem:[#allocation7 + $0x8] sm:$0xff]  }
  0x2e   :  { %v477_v19 = vld [vmem:[#allocation7] sm:$0xff]   ;;  %v374_v20 = vld [vmem:[%s654_s2] ss:$0 sm:$0xff]  ;;  %p553_p4 = por %p552_p3, %p551_p2 }
  0x2f   :  { %415 = vmatpush3.bf16.msra.mxu0 %v463_v2  ;;  %435 = vmatpush3.bf16.msra.mxu1 %v471_v13  ;;  %v383_v38 = vld [vmem:[%s656_s4] ss:$0 sm:$0xff] }
  0x30   :  { %416 = vmatprep.subr.bf16.mxu0 %v579_v0  ;;  %436 = vmatprep.subr.bf16.mxu1 %v579_v0  ;;  %v392_v2 = vld [vmem:[%s657_s5] ss:$0 sm:$0xff]  ;;  %p554_p5 = pnand %p553_p4, %p547_p1 }
  0x33   :  { %417 = vmatpush3.bf16.msra.mxu0 %v464_v3  ;;  %437 = vmatpush3.bf16.msra.mxu1 %v472_v14 }
  0x34   :  { %418 = vmatprep.subr.bf16.mxu0 %v579_v0  ;;  %438 = vmatprep.subr.bf16.mxu1 %v579_v0 }
  0x37   :  { %419 = vmatpush3.bf16.msra.mxu0 %v465_v4  ;;  %439 = vmatpush3.bf16.msra.mxu1 %v473_v15  ;;  %v393_v4 = vld [vmem:[%s658_s6] ss:$0 sm:$0xff] }
  0x38   :  { %420 = vmatprep.subr.bf16.mxu0 %v579_v0  ;;  %440 = vmatprep.subr.bf16.mxu1 %v579_v0 }
  0x3b   :  { %421 = vmatpush3.bf16.msra.mxu0 %v466_v6  ;;  %441 = vmatpush3.bf16.msra.mxu1 %v474_v16 }
  0x3c   :  { %422 = vmatprep.subr.bf16.mxu0 %v579_v0  ;;  %442 = vmatprep.subr.bf16.mxu1 %v579_v0 }
  0x3f   :  { %423 = vmatpush3.bf16.msra.mxu0 %v467_v7  ;;  %443 = vmatpush3.bf16.msra.mxu1 %v475_v17 }
  0x40   :  { %424 = vmatprep.subr.bf16.mxu0 %v579_v0  ;;  %444 = vmatprep.subr.bf16.mxu1 %v579_v0 }
  0x43   :  { %425 = vmatpush3.bf16.msra.mxu0 %v468_v8  ;;  %445 = vmatpush3.bf16.msra.mxu1 %v476_v18 }
  0x44   :  { %426 = vmatprep.subr.bf16.mxu0 %v579_v0  ;;  %446 = vmatprep.subr.bf16.mxu1 %v579_v0 }
  0x47   :  { %427 = vmatpush3.bf16.msra.mxu0 %v469_v9  ;;  %447 = vmatpush3.bf16.msra.mxu1 %v477_v19 }
  0x4a   :  { %429 = vmatmul.mubr.bf16.vlgmr.msra.gmra.mxu0 %v87_v12 }
 0x10a   :  { %v177_v21 = vpop.f32.mrf.mxu0 }
 0x10b   :  { %v178_v22 = vadd.f32 %v374_v20, %v177_v21 }
 0x10c   :  { %v430_v23 = vpop.f32.mrf.mxu0 }
 0x10d   :  { %v186_v24 = vmul.f32 0.70710677, %v178_v22  ;;  %v184_v32 = vmul.f32 0.5, %v178_v22 }
 0x10e   :  { %v180_v25 = vpop.f32.mrf.mxu0 }
 0x10f   :  { %478 = verf.f32 %v186_v24  ;;  %v181_v26 = vadd.f32 %v374_v20, %v180_v25 }
 0x110   :  { %v431_v27 = vpop.f32.mrf.mxu0 }
 0x111   :  { %v187_v28 = vmul.f32 0.70710677, %v181_v26  ;;  %v185_v33 = vmul.f32 0.5, %v181_v26 }
 0x113   :  { %480 = verf.f32 %v187_v28 }
 0x11c   :  { %v479_v29 = vpop.eup %478 }
 0x11d   :  { %v190_v30 = vadd.f32 1.0, %v479_v29 }
 0x11f   :  { %v192_v35 = vmul.f32 %v190_v30, %v184_v32 }
 0x120   :  { %v481_v31 = vpop.eup %480 }
 0x121   :  { %v191_v34 = vadd.f32 1.0, %v481_v31 }
 0x123   :  { %v193_v36 = vmul.f32 %v191_v34, %v185_v33 }
 0x125   :  { %v210_v37 = vpack.c.bf16 %v193_v36, %v192_v35 }
 0x127   :  { %449 = vmatmul.mubr.bf16.vlgmr.msra.gmra.mxu1 %v210_v37 }
 0x1e7   :  { %v300_v39 = vpop.f32.mrf.mxu1 }
 0x1e8   :  { %v301_v40 = vadd.f32 %v383_v38, %v300_v39 }
 0x1e9   :  { %v450_v41 = vpop.f32.mrf.mxu1 }
 0x1ea   :  { %v307_v42 = vadd.f32 %v301_v40, %v69_v10 }
 0x1eb   :  { %v303_v43 = vpop.f32.mrf.mxu1 }
 0x1ec   :  { %v304_v44 = vadd.f32 %v383_v38, %v303_v43  ;;  %311 = vadd.xlane.f32.xlu0 %v307_v42 }
 0x1ed   :  { %v451_v45 = vpop.f32.mrf.mxu1 }
 0x1ee   :  { %v308_v46 = vadd.f32 %v304_v44, %v70_v11 }
 0x1f0   :  { %313 = vadd.xlane.f32.xlu0 %v308_v46 }
 0x275   :  { %v312_v49 = vpop.xlane.xlu0 %311 }
 0x276   :  { %v315_v50 = vmul.f32 0.03125, %v312_v49 }
 0x278   :  { %v317_v51 = vsub.f32 %v307_v42, %v315_v50 }
 0x279   :  { %v314_v52 = vpop.xlane.xlu0 %313 }
 0x27a   :  { %v316_v53 = vmul.f32 0.03125, %v314_v52  ;;  %v322_v54 = vsel %vm321_vm1, %v317_v51, 0.0 }
 0x27b   :  { %v324_v55 = vmul.f32 %v322_v54, %v322_v54 }
 0x27c   :  { %v318_v56 = vsub.f32 %v308_v46, %v316_v53 }
 0x27d   :  { %326 = vadd.xlane.f32.xlu1 %v324_v55 }
 0x27e   :  { %v323_v57 = vsel %vm321_vm1, %v318_v56, 0.0 }
 0x27f   :  { %v325_v58 = vmul.f32 %v323_v57, %v323_v57 }
 0x281   :  { %328 = vadd.xlane.f32.xlu1 %v325_v58 }
 0x306   :  { %v327_v59 = vpop.xlane.xlu1 %326 }
 0x307   :  { %v330_v60 = vmul.f32 0.03125, %v327_v59 }
 0x309   :  { %v332_v61 = vadd.f32 1e-05, %v330_v60 }
 0x30a   :  { %v329_v62 = vpop.xlane.xlu1 %328 }
 0x30b   :  { %482 = vrsqrt.f32 %v332_v61  ;;  %v331_v63 = vmul.f32 0.03125, %v329_v62 }
 0x30d   :  { %v333_v0 = vadd.f32 1e-05, %v331_v63 }
 0x30f   :  { %484 = vrsqrt.f32 %v333_v0 }
 0x318   :  { %v483_v1 = vpop.eup %482 }
 0x319   :  { %v336_v3 = vmul.f32 %v483_v1, %v322_v54 }
 0x31b   :  { %v344_v5 = vmul.f32 %v392_v2, %v336_v3 }
 0x31c   :  { %v485_v6 = vpop.eup %484 }
 0x31d   :  { %v337_v7 = vmul.f32 %v485_v6, %v323_v57  ;;  %v352_v8 = vadd.f32 %v393_v4, %v344_v5 }
 0x31f   :  { %v345_v9 = vmul.f32 %v392_v2, %v337_v7  ;;  %354 = vst [vmem:[#allocation8] sm:$0xff] %v352_v8 }
 0x321   :  { %v353_v10 = vadd.f32 %v393_v4, %v345_v9 }
 0x323   :  { %355 = vst [vmem:[#allocation8 + $0x8] sm:$0xff] %v353_v10 }
 0x324   :  { %557 = shalt.err (!%p554_p5)
}
 0x325   :  { %367 = dma.vmem_to_hbm [thread:$0]  %s362_s24, 256, %s659_s7, [#allocation4], %s576_s11, %s576_s11, %s577_s12  }
 0x326   :  { %570 = dma.done.wait [#allocation4], 256  }
 0x327   :  { %571 = vsyncadd [#allocation4], 4294967040 }
 0x328   :  { %371 = vsyncpa [#allocation3], 1 }
 0x329   :  { %372 = vsyncpa [#allocation6], 1 }
 0x32a   :  { %373 = vsyncpa [#allocation4], 1 }

</bundles_post_ra>
